<compile_context>
chip_gen: v5e
topology: v5e:2x2
jax: 0.10.0
libtpu: 0.0.40
codegen_flags: <defaults>
</compile_context>

<pallas_src>
import jax
import jax.numpy as jnp
from jax import lax
from jax.experimental import pallas as pl
from jax.experimental.pallas import tpu as pltpu


def critic_kernel(x_ref, w1_ref, b1_ref, w2_ref, b2_ref, o_ref):
    # x_ref : (tb, F)  batch tile of x, straight from the (B, F) HBM layout
    # w1_ref: (H, F)   first-layer weight (native PyTorch (out, in) layout)
    # b1_ref: (H, 1)   first-layer bias as a column (broadcasts over lanes)
    # w2_ref: (H, 1)   second-layer weight as a column
    # b2_ref: (1,)     second-layer bias, SMEM scalar
    # o_ref : (1, tb)  lane-dense output row (batch on the lane axis)
    h = lax.dot_general(
        w1_ref[...], x_ref[...],
        dimension_numbers=(((1,), (1,)), ((), ())),      # contract on F
        preferred_element_type=jnp.float32,              # f32 accumulate
    )                                                    # (H, tb)
    h = jnp.maximum(h + b1_ref[...], 0.0)                # bias + ReLU  (VPU)
    out = jnp.sum(h * w2_ref[...], axis=0, keepdims=True)  # N=1 layer-2 (VPU+XLU)
    o_ref[...] = (out + b2_ref[0]).astype(o_ref.dtype)


# ~1 MiB of real HBM traffic per grid step; ~35 MiB of live VMEM with the
# 8->128 lane padding of the (tb, 8) input tile -> fits v7x's 64 MiB/TC.
_MAX_TB = 32768
# Once B is this large, force >=2 grid steps so the "parallel" axis can shard
# across v7x's 2 TensorCores (no effect on v5e/v6e single-TC chips).
_SPLIT_THRESHOLD = 2 * 8192


def _plan_batch_tiling(B, block_b):
    """Return (tile, num_blocks).

    Multi-block tiles are multiples of 128 (preferably 512) lanes so the
    (1, tb) output blocks stay unmasked lane-dense stores and the (8, 128)
    divisibility rule holds; padding waste is bounded by num_blocks*quantum.
    """
    block_b = max(128, min(int(block_b), _MAX_TB))
    num_blocks = pl.cdiv(B, block_b)
    if num_blocks == 1 and B >= _SPLIT_THRESHOLD:
        num_blocks = 2
    if num_blocks == 1:
        return B, 1                       # single exact block, zero padding
    quantum = 512 if block_b >= 512 else 128
    tb = pl.cdiv(pl.cdiv(B, num_blocks), quantum) * quantum
    return tb, pl.cdiv(B, tb)


def critic_forward(x, w1, b1, w2, b2, *, block_b=_MAX_TB):
    """Critic forward pass.

    x : (B, F)    input states
    w1: (H, F)    nn.Linear weight (out_features, in_features)
    b1: (H,)      nn.Linear bias
    w2: (1, H)    nn.Linear weight
    b2: (1,)      nn.Linear bias
    returns (B, 1) state values (matches the PyTorch module).
    """
    B, F = x.shape
    H = w1.shape[0]

    tb, num_blocks = _plan_batch_tiling(B, block_b)
    Bout = num_blocks * tb  # only the kernel's output row is over-allocated;
    # x itself is neither transposed nor padded.  The last grid step may read
    # a partial (out-of-range) input block; the resulting garbage only lands
    # in output columns >= B, which are sliced off below.

    b1_col = b1.reshape(H, 1)
    w2_col = w2.reshape(H, 1)
    b2_s = b2.reshape(1)

    # Live VMEM budget: 2 x (tb, 8) input tile (lanes padded 8->128)
    #                 + 2 x (1, tb) output tile (sublanes padded 1->8)
    #                 + VMEM-resident weights/biases (tiny) + headroom.
    vmem_need = 2 * (tb * 128 * 4) + 2 * (8 * tb * 4) + (1 << 20)
    vmem_limit = min(max(vmem_need, 16 << 20), 56 << 20)

    out = pl.pallas_call(
        critic_kernel,
        out_shape=jax.ShapeDtypeStruct((1, Bout), x.dtype),
        grid=(num_blocks,),
        in_specs=[
            # batch-tiled activation, pipelined / double-buffered
            pl.BlockSpec((tb, F), lambda i: (i, 0)),
            # weights/biases: constant index_map -> DMA'd once, VMEM-resident
            pl.BlockSpec((H, F), lambda i: (0, 0)),
            pl.BlockSpec((H, 1), lambda i: (0, 0)),
            pl.BlockSpec((H, 1), lambda i: (0, 0)),
            # scalar bias in SMEM
            pl.BlockSpec(memory_space=pltpu.MemorySpace.SMEM),
        ],
        out_specs=pl.BlockSpec((1, tb), lambda i: (0, i)),
        compiler_params=pltpu.CompilerParams(
            dimension_semantics=("parallel",),
            vmem_limit_bytes=vmem_limit,
        ),
    )(x, w1, b1_col, w2_col, b2_s)

    # Lane-dense (1, Bout) row -> (B, 1) to match the PyTorch module's output.
    # Consumers that can take a (1, B) row / (B,) vector should slice `out`
    # directly and skip this layout change.
    return out[0, :B].reshape(B, 1)


def init_critic_params(key, n_features, n_neuron, dtype=jnp.float32):
    """Deterministic init mimicking nn.Linear's uniform(-1/sqrt(fan_in), ...),
    in the native PyTorch (out_features, in_features) layout."""
    k1, k2, k3, k4 = jax.random.split(key, 4)
    bound1 = 1.0 / (n_features ** 0.5)
    bound2 = 1.0 / (n_neuron ** 0.5)
    w1 = jax.random.uniform(k1, (n_neuron, n_features), dtype, -bound1, bound1)
    b1 = jax.random.uniform(k2, (n_neuron,), dtype, -bound1, bound1)
    w2 = jax.random.uniform(k3, (1, n_neuron), dtype, -bound2, bound2)
    b2 = jax.random.uniform(k4, (1,), dtype, -bound2, bound2)
    return w1, b1, w2, b2


def _reference(x, w1, b1, w2, b2):
    return jnp.maximum(x @ w1.T + b1, 0.0) @ w2.T + b2


if __name__ == "__main__":
    n_features = 8   # input state dimension
    n_neuron = 32    # hidden width
    batch = 2

    key = jax.random.PRNGKey(0)
    kx, kp = jax.random.split(key)
    x = jax.random.normal(kx, (batch, n_features), jnp.float32)
    w1, b1, w2, b2 = init_critic_params(kp, n_features, n_neuron)

    # Small-batch path (single grid step, block == full array dims).
    out = jax.block_until_ready(critic_forward(x, w1, b1, w2, b2))
    ref = _reference(x, w1, b1, w2, b2)
    assert out.shape == (batch, 1)
    assert jnp.allclose(out, ref, atol=1e-5, rtol=1e-5)

    # Larger batch exercising the tiled grid path with a partial (out-of-range)
    # final input block -- padded output columns are sliced off.
    big_batch = 300
    xb = jax.random.normal(jax.random.PRNGKey(1), (big_batch, n_features),
                           jnp.float32)
    outb = jax.block_until_ready(
        critic_forward(xb, w1, b1, w2, b2, block_b=128))
    refb = _reference(xb, w1, b1, w2, b2)
    assert outb.shape == (big_batch, 1)
    assert jnp.allclose(outb, refb, atol=1e-5, rtol=1e-5)

    print("KERNEL_OK")
</pallas_src>

<mosaic_0001>
module attributes {stable_mosaic.version = 11 : i64} {
  func.func @critic_kernel(%arg0: i32, %arg1: memref<2x8xf32, #tpu.memory_space<vmem>>, %arg2: memref<32x8xf32, #tpu.memory_space<vmem>>, %arg3: memref<32x1xf32, #tpu.memory_space<vmem>>, %arg4: memref<32x1xf32, #tpu.memory_space<vmem>>, %arg5: memref<1xf32, #tpu.memory_space<smem>>, %arg6: memref<1x2xf32, #tpu.memory_space<vmem>>) attributes {dimension_semantics = [#tpu.dimension_semantics<parallel>], iteration_bounds = array<i64: 1>, scalar_prefetch = 0 : i64, scratch_operands = 0 : i64, tpu.core_type = #tpu.core_type<tc>, window_params = [{transform_indices = @transform_0, window_bounds = array<i64: 2, 8>}, {pipeline_mode = #tpu.pipeline_mode<synchronous>, transform_indices = @transform_1, window_bounds = array<i64: 32, 8>}, {pipeline_mode = #tpu.pipeline_mode<synchronous>, transform_indices = @transform_2, window_bounds = array<i64: 32, 1>}, {pipeline_mode = #tpu.pipeline_mode<synchronous>, transform_indices = @transform_3, window_bounds = array<i64: 32, 1>}, {transform_indices = @transform_4, window_bounds = array<i64: 1>}, {transform_indices = @transform_5, window_bounds = array<i64: 1, 2>}]} {
    %c0 = arith.constant 0 : index
    %c0_0 = arith.constant 0 : index
    %0 = vector.load %arg2[%c0, %c0_0] : memref<32x8xf32, #tpu.memory_space<vmem>>, vector<32x8xf32>
    %c0_1 = arith.constant 0 : index
    %c0_2 = arith.constant 0 : index
    %1 = vector.load %arg1[%c0_1, %c0_2] : memref<2x8xf32, #tpu.memory_space<vmem>>, vector<2x8xf32>
    %cst = arith.constant dense<0.000000e+00> : vector<32x2xf32>
    %2 = tpu.matmul %0, %1, %cst {dimension_numbers = #tpu.dot_dimension_numbers<[1], [1], [0], [0], [0, 0, 1, 0], [], []>} : vector<32x8xf32>, vector<2x8xf32>, vector<32x2xf32> -> vector<32x2xf32>
    %c0_3 = arith.constant 0 : index
    %c0_4 = arith.constant 0 : index
    %3 = vector.load %arg3[%c0_3, %c0_4] : memref<32x1xf32, #tpu.memory_space<vmem>>, vector<32x1xf32>
    %4 = vector.broadcast %3 : vector<32x1xf32> to vector<32x2xf32>
    %5 = arith.addf %2, %4 : vector<32x2xf32>
    %cst_5 = arith.constant 0.000000e+00 : f32
    %6 = vector.broadcast %cst_5 : f32 to vector<32x2xf32>
    %7 = arith.maximumf %5, %6 : vector<32x2xf32>
    %c0_6 = arith.constant 0 : index
    %c0_7 = arith.constant 0 : index
    %8 = vector.load %arg4[%c0_6, %c0_7] : memref<32x1xf32, #tpu.memory_space<vmem>>, vector<32x1xf32>
    %9 = vector.broadcast %8 : vector<32x1xf32> to vector<32x2xf32>
    %10 = arith.mulf %7, %9 : vector<32x2xf32>
    %cst_8 = arith.constant dense<0.000000e+00> : vector<2xf32>
    %11 = vector.multi_reduction <add>, %10, %cst_8 [0] : vector<32x2xf32> to vector<2xf32>
    %12 = vector.shape_cast %11 : vector<2xf32> to vector<1x2xf32>
    %c0_9 = arith.constant 0 : index
    %13 = memref.load %arg5[%c0_9] : memref<1xf32, #tpu.memory_space<smem>>
    %14 = vector.broadcast %13 : f32 to vector<1x2xf32>
    %15 = arith.addf %12, %14 : vector<1x2xf32>
    %c0_10 = arith.constant 0 : index
    %c0_11 = arith.constant 0 : index
    %16 = vector.load %arg6[%c0_10, %c0_11] : memref<1x2xf32, #tpu.memory_space<vmem>>, vector<1x2xf32>
    tpu.vector_store %arg6[%c0_10, %c0_11], %15 {strides = array<i32>} : memref<1x2xf32, #tpu.memory_space<vmem>>, vector<1x2xf32>,
    return
  }
  func.func @transform_0(%arg0: i32) -> (i32, i32) {
    %c0_i32 = arith.constant 0 : i32
    %c0_i32_0 = arith.constant 0 : i32
    return %arg0, %c0_i32 : i32, i32
  }
  func.func @transform_1(%arg0: i32) -> (i32, i32) {
    %c0_i32 = arith.constant 0 : i32
    %c0_i32_0 = arith.constant 0 : i32
    %c0_i32_1 = arith.constant 0 : i32
    return %c0_i32, %c0_i32_0 : i32, i32
  }
  func.func @transform_2(%arg0: i32) -> (i32, i32) {
    %c0_i32 = arith.constant 0 : i32
    %c0_i32_0 = arith.constant 0 : i32
    %c0_i32_1 = arith.constant 0 : i32
    return %c0_i32, %c0_i32_0 : i32, i32
  }
  func.func @transform_3(%arg0: i32) -> (i32, i32) {
    %c0_i32 = arith.constant 0 : i32
    %c0_i32_0 = arith.constant 0 : i32
    %c0_i32_1 = arith.constant 0 : i32
    return %c0_i32, %c0_i32_0 : i32, i32
  }
  func.func @transform_4(%arg0: i32) -> i32 {
    %c0_i32 = arith.constant 0 : i32
    %c0_i32_0 = arith.constant 0 : i32
    return %c0_i32 : i32
  }
  func.func @transform_5(%arg0: i32) -> (i32, i32) {
    %c0_i32 = arith.constant 0 : i32
    %c0_i32_0 = arith.constant 0 : i32
    return %c0_i32, %arg0 : i32, i32
  }
}

</mosaic_0001>

<bundles_post_ra>
// kernel: tpu_custom_call.1
= control target key start
LH: loop header
LB: loop body
LE: loop exit
PB: predicated region body
PF: predicated region fallthrough
CT: control target
= control target key end

     0   :  { %vm51_vm0 = vcmask 64512   ;;  %v202_v1 = vmov 0   ;;  %s291_s0 = inlined_call_operand.vmem [shape: f32[2,8], index: 0, kind: input, shape index: {}]   ;;  %s292_s1 = inlined_call_operand.vmem [shape: f32[32,8], index: 1, kind: input, shape index: {}]   ;;  %s293_s2 = inlined_call_operand.vmem [shape: f32[32,1], index: 2, kind: input, shape index: {}]   ;;  %s294_s3 = inlined_call_operand.vmem [shape: f32[32,1], index: 3, kind: input, shape index: {}]   ;;  %s295_s4 = inlined_call_operand.<no memory space> [shape: f32[1], index: 4, kind: input, shape index: {}]   ;;  %s296_s5 = inlined_call_operand.hbm [shape: f32[1,2], index: 5, kind: output, shape index: {}]  }
   0x1   :  { %v26_v0 = vld [vmem:[%s291_s0] sm:$0x3]  ;;  %174 = vset.pattern.permute.xlu1 %v202_v1  ;;  %173 = vset.pattern.permute.xlu0 %v202_v1  ;;  %v29_v2 = vld [vmem:[%s293_s2 + $0x10] sm:$0xff]  ;;  %v23_v5 = vld [vmem:[%s292_s1 + $0x8] sm:$0xff] }
   0x2   :  { %v27_v3 = vld [vmem:[%s293_s2] sm:$0xff]  ;;  %163 = vmatpush.xpose.msk.msra.mxu0 %vm51_vm0, %v26_v0  ;;  %168 = vmatpush.xpose.msk.msra.mxu1 %vm51_vm0, %v26_v0  ;;  %v24_v6 = vld [vmem:[%s292_s1 + $0x10] sm:$0xff]  ;;  %v25_v7 = vld [vmem:[%s292_s1 + $0x18] sm:$0xff] }
   0x3   :  { %v22_v4 = vld [vmem:[%s292_s1] sm:$0xff]  ;;  %169 = vmatpush.xpose.msk.msra.mxu2 %vm51_vm0, %v26_v0  ;;  %170 = vmatpush.xpose.msk.msra.mxu3 %vm51_vm0, %v26_v0 }
   0x4   :  { %43 = vperm.xlu1 %174, %v29_v2   ;;  %33 = vperm.xlu0 %173, %v27_v3  }
   0x5   :  { %11 = vsyncpa [#allocation4], 0  ;;  %164 = vmatmul.msk.f32.vlgmr.msra.gmra.mxu0 %vm51_vm0, %v22_v4  ;;  %165 = vmatmul.msk.f32.vlgmr.msra.gmra.mxu1 %vm51_vm0, %v23_v5  ;;  %v100_v8 = vld [vmem:[%s294_s3] sm:$0xff]  ;;  %v30_v9 = vld [vmem:[%s293_s2 + $0x18] sm:$0xff]  ;;  %vm128_vm1 = vcmask 15360   ;;  %v143_v50 = vstv %s295_s4  ;;  %s203_s17 = smov [#allocation3]  }
   0x6   :  { %166 = vmatmul.msk.f32.vlgmr.msra.gmra.mxu2 %vm51_vm0, %v24_v6  ;;  %167 = vmatmul.msk.f32.vlgmr.msra.gmra.mxu3 %vm51_vm0, %v25_v7  ;;  %v28_v10 = vld [vmem:[%s293_s2 + $0x8] sm:$0xff]  ;;  %v103_v12 = vld [vmem:[%s294_s3 + $0x18] sm:$0xff]  ;;  %v102_v13 = vld [vmem:[%s294_s3 + $0x10] sm:$0xff]  ;;  %s152_s18 = sshll.u32 %s203_s17, 4  ;;  %s154_s21 = sshll.u32 %s296_s5, 4  ;;  %vm145_vm2 = vcmask 8192   ;;  %s153_s18 = int_to_ptr.vmem [resolvable:$true] %s152_s18  ;;  %s155_s21 = int_to_ptr.hbm [resolvable:$true] %s154_s21 }
   0x7   :  { %175 = vset.pattern.permute.xlu2 %v202_v1  ;;  %v101_v11 = vld [vmem:[%s294_s3 + $0x8] sm:$0xff] }
   0x8   :  { %106 = vperm.xlu2 %175, %v100_v8  }
   0xc   :  { %48 = vperm.xlu1 %174, %v30_v9   ;;  %38 = vperm.xlu0 %173, %v28_v10  }
  0x10   :  { %111 = vperm.xlu2 %175, %v101_v11  }
  0x14   :  { %121 = vperm.xlu1 %174, %v103_v12   ;;  %116 = vperm.xlu0 %173, %v102_v13  }
  0x62   :  { %v107_v16 = vpop.permute.xlu2 %106 }
  0x6a   :  { %v112_v25 = vpop.permute.xlu2 %111 }
  0x76   :  { %v34_v14 = vpop.permute.xlu0 %33  ;;  %v44_v15 = vpop.permute.xlu1 %43 }
  0x7e   :  { %v39_v17 = vpop.permute.xlu0 %38  ;;  %v49_v20 = vpop.permute.xlu1 %48 }
  0x82   :  { %v84_v18 = vpop.f32.mrf.mxu0  ;;  %v87_v19 = vpop.f32.mrf.mxu1 }
  0x83   :  { %v85_v21 = vadd.f32 %v84_v18, %v34_v14  ;;  %v88_v22 = vadd.f32 %v87_v19, %v39_v17 }
  0x85   :  { %v96_v23 = vmax.f32 %v85_v21, 0.0  ;;  %v97_v24 = vmax.f32 %v88_v22, 0.0 }
  0x86   :  { %v122_v36 = vpop.permute.xlu1 %121  ;;  %v117_v37 = vpop.permute.xlu0 %116 }
  0x87   :  { %v124_v26 = vmul.f32 %v107_v16, %v96_v23  ;;  %v125_v27 = vmul.f32 %v112_v25, %v97_v24 }
  0x89   :  { %v90_v28 = vpop.f32.mrf.mxu2  ;;  %v93_v29 = vpop.f32.mrf.mxu3  ;;  %v129_v32 = vsel %vm128_vm1, %v124_v26, 0.0  ;;  %v130_v33 = vsel %vm128_vm1, %v125_v27, 0.0 }
  0x8a   :  { %v91_v30 = vadd.f32 %v90_v28, %v44_v15  ;;  %v94_v31 = vadd.f32 %v93_v29, %v49_v20  ;;  %v131_v40 = vadd.f32 %v130_v33, %v129_v32 }
  0x8c   :  { %v98_v34 = vmax.f32 %v91_v30, 0.0  ;;  %v99_v35 = vmax.f32 %v94_v31, 0.0 }
  0x8e   :  { %v126_v38 = vmul.f32 %v117_v37, %v98_v34  ;;  %v127_v39 = vmul.f32 %v122_v36, %v99_v35 }
  0x90   :  { %v132_v41 = vsel %vm128_vm1, %v126_v38, 0.0  ;;  %v134_v43 = vsel %vm128_vm1, %v127_v39, 0.0 }
  0x91   :  { %v133_v42 = vadd.f32 %v132_v41, %v131_v40 }
  0x93   :  { %v135_v44 = vadd.f32 %v134_v43, %v133_v42 }
  0x95   :  { %v136_v45 = vrot.slane %v135_v44, 4 }
  0x97   :  { %v137_v46 = vadd.f32 %v136_v45, %v135_v44 }
  0x99   :  { %v138_v47 = vrot.slane %v137_v46, 2 }
  0x9b   :  { %v139_v48 = vadd.f32 %v138_v47, %v137_v46 }
  0x9d   :  { %v140_v49 = vrot.slane %v139_v48, 1 }
  0x9f   :  { %v141_v51 = vadd.f32 %v140_v49, %v139_v48 }
  0xa1   :  { %v144_v52 = vadd.f32 %v143_v50, %v141_v51 }
  0xa3   :  { %146 = vst.msk [vmem:[#allocation3] sm:$0x1] %vm145_vm2, %v144_v52 }
  0xa4   :  { %157 = dma.vmem_to_hbm [thread:$0]  %s153_s18, 16, %s155_s21, [#allocation4]  }
  0xa5   :  { %200 = dma.done.wait [#allocation4], 16  }
  0xa6   :  { %201 = vsyncadd [#allocation4], 4294967280 }
  0xa7   :  { %162 = vsyncpa [#allocation4], 1 }

</bundles_post_ra>
